<compile_context>
chip_gen: v6e
topology: v6e:2x2x1
jax: 0.10.0
libtpu: 0.0.40
codegen_flags: <defaults>
</compile_context>

<pallas_src>
import jax
import jax.numpy as jnp
from jax.experimental import pallas as pl
from jax.experimental.pallas import tpu as pltpu


def _round_up(x, m):
    return (x + m - 1) // m * m


# ---------------------------------------------------------------------------
# Kernel
# ---------------------------------------------------------------------------
def _mlp_kernel(u_ref, v_ref, w1u_ref, w1v_ref, b1_ref, w2_ref, b2_ref,
                w3_ref, b3_ref, w4_ref, b4_ref, out_ref):
    bf16 = jnp.bfloat16

    # ---- first layer: dot(user, W1u) + dot(item, W1v) + b1, sigmoid --------
    z = jnp.dot(u_ref[...].astype(bf16), w1u_ref[...],
                preferred_element_type=jnp.float32)
    z = z + jnp.dot(v_ref[...].astype(bf16), w1v_ref[...],
                    preferred_element_type=jnp.float32)
    h = jax.nn.sigmoid(z + b1_ref[...])                      # f32 math

    # ---- hidden clone 0 -----------------------------------------------------
    z = jnp.dot(h.astype(bf16), w2_ref[...],
                preferred_element_type=jnp.float32)
    h = jax.nn.sigmoid(z + b2_ref[...])

    # ---- hidden clone 1 -----------------------------------------------------
    z = jnp.dot(h.astype(bf16), w3_ref[...],
                preferred_element_type=jnp.float32)
    h = jax.nn.sigmoid(z + b3_ref[...])

    # ---- last layer: (1,H) x (TB,H)^T -> (1,TB) lane-dense result ----------
    # NT dot_general: contracts the hidden dim of both operands, so the result
    # lands with batch on the lane axis and the output store is unmasked.
    r = jax.lax.dot_general(
        w4_ref[...], h.astype(bf16),
        dimension_numbers=(((1,), (1,)), ((), ())),
        preferred_element_type=jnp.float32)                  # (1, TB)
    out_ref[...] = r + b4_ref[0, 0]                          # b4 scalar (SMEM)


# ---------------------------------------------------------------------------
# Parameter preparation (one-time glue): split W1, pad hidden, cast to bf16.
# ---------------------------------------------------------------------------
def _prepare_params(params, emsize, hidden_pad):
    w1, b1, w2, b2, w3, b3, w4, b4 = params
    Hp = hidden_pad

    def pad2(a, rows, cols):
        return jnp.pad(a, ((0, rows - a.shape[0]), (0, cols - a.shape[1])))

    w1u = pad2(w1[:emsize, :], emsize, Hp).astype(jnp.bfloat16)
    w1v = pad2(w1[emsize:, :], emsize, Hp).astype(jnp.bfloat16)
    w2p = pad2(w2, Hp, Hp).astype(jnp.bfloat16)
    w3p = pad2(w3, Hp, Hp).astype(jnp.bfloat16)
    w4p = pad2(w4.T, 1, Hp).astype(jnp.bfloat16)             # stored as (1, Hp)

    b1p = pad2(b1.reshape(1, -1), 1, Hp).astype(jnp.float32)
    b2p = pad2(b2.reshape(1, -1), 1, Hp).astype(jnp.float32)
    b3p = pad2(b3.reshape(1, -1), 1, Hp).astype(jnp.float32)
    b4p = b4.reshape(1, 1).astype(jnp.float32)
    return w1u, w1v, b1p, w2p, b2p, w3p, b3p, w4p, b4p


# ---------------------------------------------------------------------------
# Wrapper
# ---------------------------------------------------------------------------
def mlp_for_comp(user, item, params, *, block_b=256):
    """Pallas implementation of MLP_for_comp.forward."""
    B, E = user.shape
    assert item.shape == (B, E)

    H = params[0].shape[1]
    Hp = _round_up(H, 128)          # 256-aligned preferred on v6e/v7x at real H
    (w1u, w1v, b1, w2, b2, w3, b3, w4, b4) = _prepare_params(params, E, Hp)

    # Batch tiling: TB multiple of 128 (lane-dense out block), batch zero-padded.
    TB = min(_round_up(block_b, 128), _round_up(B, 128))
    Bp = _round_up(B, TB)
    if Bp != B:
        user = jnp.pad(user, ((0, Bp - B), (0, 0)))
        item = jnp.pad(item, ((0, Bp - B), (0, 0)))
    user = user.astype(jnp.float32)
    item = item.astype(jnp.float32)

    grid = (Bp // TB,)

    def const(a):   # whole array resident, same block every grid step
        return pl.BlockSpec(a.shape, lambda i: (0,) * a.ndim)

    # Advisory cost estimate (logical, unpadded sizes).
    flops = int(2 * B * (2 * E * H + 2 * H * H + H))
    transcendentals = int(3 * B * H)
    operands = (user, item, w1u, w1v, b1, w2, b2, w3, b3, w4, b4)
    bytes_accessed = int(sum(a.size * a.dtype.itemsize for a in operands)
                         + Bp * 4)

    # Explicit VMEM budget: resident weights + double-buffered in/out blocks
    # + f32/bf16 activation temporaries, with headroom.
    weight_bytes = int(sum(a.size * a.dtype.itemsize
                           for a in (w1u, w1v, b1, w2, b2, w3, b3, w4)))
    act_bytes = 2 * (2 * TB * E * 4 + TB * 4)
    scratch_bytes = 6 * TB * Hp * 4
    vmem_limit = int(min(max(weight_bytes + act_bytes + scratch_bytes
                             + (4 << 20), 32 << 20), 64 << 20))

    out = pl.pallas_call(
        _mlp_kernel,
        out_shape=jax.ShapeDtypeStruct((1, Bp), jnp.float32),
        grid=grid,
        in_specs=[
            pl.BlockSpec((TB, E), lambda i: (i, 0)),          # user rows
            pl.BlockSpec((TB, E), lambda i: (i, 0)),          # item rows
            const(w1u), const(w1v), const(b1),
            const(w2), const(b2),
            const(w3), const(b3),
            const(w4),
            pl.BlockSpec(memory_space=pltpu.MemorySpace.SMEM),  # b4 scalar
        ],
        out_specs=pl.BlockSpec((1, TB), lambda i: (0, i)),    # lane-dense out
        compiler_params=pltpu.CompilerParams(
            dimension_semantics=("parallel",),
            vmem_limit_bytes=vmem_limit),
        cost_estimate=pl.CostEstimate(flops=flops,
                                      transcendentals=transcendentals,
                                      bytes_accessed=bytes_accessed),
    )(user, item, w1u, w1v, b1, w2, b2, w3, b3, w4, b4)

    # torch.squeeze semantics: (B,) for B > 1, scalar for B == 1.
    return jnp.squeeze(out[0, :B])


# ---------------------------------------------------------------------------
# Init mirroring MLP_for_comp.init_weights(): weights ~ U(-0.1, 0.1), biases 0.
# Weights stored as [in_features, out_features] (pre-transposed), f32.
# ---------------------------------------------------------------------------
def init_params(key, emsize, hidden_size):
    initrange = 0.1
    k1, k2, k3, k4 = jax.random.split(key, 4)
    w1 = jax.random.uniform(k1, (2 * emsize, hidden_size), jnp.float32,
                            -initrange, initrange)
    b1 = jnp.zeros((hidden_size,), jnp.float32)
    w2 = jax.random.uniform(k2, (hidden_size, hidden_size), jnp.float32,
                            -initrange, initrange)
    b2 = jnp.zeros((hidden_size,), jnp.float32)
    w3 = jax.random.uniform(k3, (hidden_size, hidden_size), jnp.float32,
                            -initrange, initrange)
    b3 = jnp.zeros((hidden_size,), jnp.float32)
    w4 = jax.random.uniform(k4, (hidden_size, 1), jnp.float32,
                            -initrange, initrange)
    b4 = jnp.zeros((1,), jnp.float32)
    return (w1, b1, w2, b2, w3, b3, w4, b4)


def _reference(user, item, params):
    """Pure-JAX f32 reference for correctness checking."""
    w1, b1, w2, b2, w3, b3, w4, b4 = params
    x = jnp.concatenate([user, item], axis=1)
    h = jax.nn.sigmoid(x @ w1 + b1)
    h = jax.nn.sigmoid(h @ w2 + b2)
    h = jax.nn.sigmoid(h @ w3 + b3)
    return jnp.squeeze(h @ w4 + b4)


if __name__ == "__main__":
    key = jax.random.PRNGKey(0)
    kp, ku, ki = jax.random.split(key, 3)

    batch = 8
    emsize = 16
    hidden = 32

    params = init_params(kp, emsize, hidden)
    user = jax.random.normal(ku, (batch, emsize), jnp.float32)
    item = jax.random.normal(ki, (batch, emsize), jnp.float32)

    rating = jax.block_until_ready(mlp_for_comp(user, item, params))
    ref = _reference(user, item, params)

    assert rating.shape == (batch,), rating.shape
    # bf16 MXU operands + f32 accumulation vs pure-f32 reference.
    assert jnp.allclose(rating, ref, atol=5e-2, rtol=5e-2), (rating, ref)

    print("KERNEL_OK")
</pallas_src>

<mosaic_0001>
module attributes {stable_mosaic.version = 11 : i64} {
  func.func @_mlp_kernel(%arg0: i32, %arg1: memref<128x16xf32, #tpu.memory_space<vmem>>, %arg2: memref<128x16xf32, #tpu.memory_space<vmem>>, %arg3: memref<16x128xbf16, #tpu.memory_space<vmem>>, %arg4: memref<16x128xbf16, #tpu.memory_space<vmem>>, %arg5: memref<1x128xf32, #tpu.memory_space<vmem>>, %arg6: memref<128x128xbf16, #tpu.memory_space<vmem>>, %arg7: memref<1x128xf32, #tpu.memory_space<vmem>>, %arg8: memref<128x128xbf16, #tpu.memory_space<vmem>>, %arg9: memref<1x128xf32, #tpu.memory_space<vmem>>, %arg10: memref<1x128xbf16, #tpu.memory_space<vmem>>, %arg11: memref<1x1xf32, #tpu.memory_space<smem>>, %arg12: memref<1x128xf32, #tpu.memory_space<vmem>>) attributes {dimension_semantics = [#tpu.dimension_semantics<parallel>], iteration_bounds = array<i64: 1>, scalar_prefetch = 0 : i64, scratch_operands = 0 : i64, tpu.core_type = #tpu.core_type<tc>, window_params = [{transform_indices = @transform_0, window_bounds = array<i64: 128, 16>}, {transform_indices = @transform_1, window_bounds = array<i64: 128, 16>}, {pipeline_mode = #tpu.pipeline_mode<synchronous>, transform_indices = @transform_2, window_bounds = array<i64: 16, 128>}, {pipeline_mode = #tpu.pipeline_mode<synchronous>, transform_indices = @transform_3, window_bounds = array<i64: 16, 128>}, {pipeline_mode = #tpu.pipeline_mode<synchronous>, transform_indices = @transform_4, window_bounds = array<i64: 1, 128>}, {pipeline_mode = #tpu.pipeline_mode<synchronous>, transform_indices = @transform_5, window_bounds = array<i64: 128, 128>}, {pipeline_mode = #tpu.pipeline_mode<synchronous>, transform_indices = @transform_6, window_bounds = array<i64: 1, 128>}, {pipeline_mode = #tpu.pipeline_mode<synchronous>, transform_indices = @transform_7, window_bounds = array<i64: 128, 128>}, {pipeline_mode = #tpu.pipeline_mode<synchronous>, transform_indices = @transform_8, window_bounds = array<i64: 1, 128>}, {pipeline_mode = #tpu.pipeline_mode<synchronous>, transform_indices = @transform_9, window_bounds = array<i64: 1, 128>}, {transform_indices = @transform_10, window_bounds = array<i64: 1, 1>}, {transform_indices = @transform_11, window_bounds = array<i64: 1, 128>}]} {
    %c0 = arith.constant 0 : index
    %c0_0 = arith.constant 0 : index
    %0 = vector.load %arg1[%c0, %c0_0] : memref<128x16xf32, #tpu.memory_space<vmem>>, vector<128x16xf32>
    %1 = arith.truncf %0 : vector<128x16xf32> to vector<128x16xbf16>
    %c0_1 = arith.constant 0 : index
    %c0_2 = arith.constant 0 : index
    %2 = vector.load %arg3[%c0_1, %c0_2] : memref<16x128xbf16, #tpu.memory_space<vmem>>, vector<16x128xbf16>
    %cst = arith.constant dense<0.000000e+00> : vector<128x128xf32>
    %3 = tpu.matmul %1, %2, %cst {dimension_numbers = #tpu.dot_dimension_numbers<[1], [0], [0], [1], [0, 0, 1, 1], [], []>} : vector<128x16xbf16>, vector<16x128xbf16>, vector<128x128xf32> -> vector<128x128xf32>
    %c0_3 = arith.constant 0 : index
    %c0_4 = arith.constant 0 : index
    %4 = vector.load %arg2[%c0_3, %c0_4] : memref<128x16xf32, #tpu.memory_space<vmem>>, vector<128x16xf32>
    %5 = arith.truncf %4 : vector<128x16xf32> to vector<128x16xbf16>
    %c0_5 = arith.constant 0 : index
    %c0_6 = arith.constant 0 : index
    %6 = vector.load %arg4[%c0_5, %c0_6] : memref<16x128xbf16, #tpu.memory_space<vmem>>, vector<16x128xbf16>
    %cst_7 = arith.constant dense<0.000000e+00> : vector<128x128xf32>
    %7 = tpu.matmul %5, %6, %cst_7 {dimension_numbers = #tpu.dot_dimension_numbers<[1], [0], [0], [1], [0, 0, 1, 1], [], []>} : vector<128x16xbf16>, vector<16x128xbf16>, vector<128x128xf32> -> vector<128x128xf32>
    %8 = arith.addf %3, %7 : vector<128x128xf32>
    %c0_8 = arith.constant 0 : index
    %c0_9 = arith.constant 0 : index
    %9 = vector.load %arg5[%c0_8, %c0_9] : memref<1x128xf32, #tpu.memory_space<vmem>>, vector<1x128xf32>
    %10 = vector.broadcast %9 : vector<1x128xf32> to vector<128x128xf32>
    %11 = arith.addf %8, %10 : vector<128x128xf32>
    %12 = arith.negf %11 : vector<128x128xf32>
    %13 = math.exp %12 : vector<128x128xf32>
    %cst_10 = arith.constant 1.000000e+00 : f32
    %14 = vector.broadcast %cst_10 : f32 to vector<128x128xf32>
    %15 = arith.addf %14, %13 : vector<128x128xf32>
    %16 = arith.divf %14, %15 : vector<128x128xf32>
    %17 = arith.truncf %16 : vector<128x128xf32> to vector<128x128xbf16>
    %c0_11 = arith.constant 0 : index
    %c0_12 = arith.constant 0 : index
    %18 = vector.load %arg6[%c0_11, %c0_12] : memref<128x128xbf16, #tpu.memory_space<vmem>>, vector<128x128xbf16>
    %cst_13 = arith.constant dense<0.000000e+00> : vector<128x128xf32>
    %19 = tpu.matmul %17, %18, %cst_13 {dimension_numbers = #tpu.dot_dimension_numbers<[1], [0], [0], [1], [0, 0, 1, 1], [], []>} : vector<128x128xbf16>, vector<128x128xbf16>, vector<128x128xf32> -> vector<128x128xf32>
    %c0_14 = arith.constant 0 : index
    %c0_15 = arith.constant 0 : index
    %20 = vector.load %arg7[%c0_14, %c0_15] : memref<1x128xf32, #tpu.memory_space<vmem>>, vector<1x128xf32>
    %21 = vector.broadcast %20 : vector<1x128xf32> to vector<128x128xf32>
    %22 = arith.addf %19, %21 : vector<128x128xf32>
    %23 = arith.negf %22 : vector<128x128xf32>
    %24 = math.exp %23 : vector<128x128xf32>
    %cst_16 = arith.constant 1.000000e+00 : f32
    %25 = vector.broadcast %cst_16 : f32 to vector<128x128xf32>
    %26 = arith.addf %25, %24 : vector<128x128xf32>
    %27 = arith.divf %25, %26 : vector<128x128xf32>
    %28 = arith.truncf %27 : vector<128x128xf32> to vector<128x128xbf16>
    %c0_17 = arith.constant 0 : index
    %c0_18 = arith.constant 0 : index
    %29 = vector.load %arg8[%c0_17, %c0_18] : memref<128x128xbf16, #tpu.memory_space<vmem>>, vector<128x128xbf16>
    %cst_19 = arith.constant dense<0.000000e+00> : vector<128x128xf32>
    %30 = tpu.matmul %28, %29, %cst_19 {dimension_numbers = #tpu.dot_dimension_numbers<[1], [0], [0], [1], [0, 0, 1, 1], [], []>} : vector<128x128xbf16>, vector<128x128xbf16>, vector<128x128xf32> -> vector<128x128xf32>
    %c0_20 = arith.constant 0 : index
    %c0_21 = arith.constant 0 : index
    %31 = vector.load %arg9[%c0_20, %c0_21] : memref<1x128xf32, #tpu.memory_space<vmem>>, vector<1x128xf32>
    %32 = vector.broadcast %31 : vector<1x128xf32> to vector<128x128xf32>
    %33 = arith.addf %30, %32 : vector<128x128xf32>
    %34 = arith.negf %33 : vector<128x128xf32>
    %35 = math.exp %34 : vector<128x128xf32>
    %cst_22 = arith.constant 1.000000e+00 : f32
    %36 = vector.broadcast %cst_22 : f32 to vector<128x128xf32>
    %37 = arith.addf %36, %35 : vector<128x128xf32>
    %38 = arith.divf %36, %37 : vector<128x128xf32>
    %c0_23 = arith.constant 0 : index
    %c0_24 = arith.constant 0 : index
    %39 = vector.load %arg10[%c0_23, %c0_24] : memref<1x128xbf16, #tpu.memory_space<vmem>>, vector<1x128xbf16>
    %40 = arith.truncf %38 : vector<128x128xf32> to vector<128x128xbf16>
    %cst_25 = arith.constant dense<0.000000e+00> : vector<1x128xf32>
    %41 = tpu.matmul %39, %40, %cst_25 {dimension_numbers = #tpu.dot_dimension_numbers<[1], [1], [0], [0], [0, 0, 1, 0], [], []>} : vector<1x128xbf16>, vector<128x128xbf16>, vector<1x128xf32> -> vector<1x128xf32>
    %c0_26 = arith.constant 0 : index
    %c0_27 = arith.constant 0 : index
    %42 = memref.load %arg11[%c0_26, %c0_27] : memref<1x1xf32, #tpu.memory_space<smem>>
    %43 = vector.broadcast %42 : f32 to vector<1x128xf32>
    %44 = arith.addf %41, %43 : vector<1x128xf32>
    %c0_28 = arith.constant 0 : index
    %c0_29 = arith.constant 0 : index
    %45 = vector.load %arg12[%c0_28, %c0_29] : memref<1x128xf32, #tpu.memory_space<vmem>>, vector<1x128xf32>
    tpu.vector_store %arg12[%c0_28, %c0_29], %44 {strides = array<i32>} : memref<1x128xf32, #tpu.memory_space<vmem>>, vector<1x128xf32>,
    return
  }
  func.func @transform_0(%arg0: i32) -> (i32, i32) {
    %c0_i32 = arith.constant 0 : i32
    %c0_i32_0 = arith.constant 0 : i32
    return %arg0, %c0_i32 : i32, i32
  }
  func.func @transform_1(%arg0: i32) -> (i32, i32) {
    %c0_i32 = arith.constant 0 : i32
    %c0_i32_0 = arith.constant 0 : i32
    return %arg0, %c0_i32 : i32, i32
  }
  func.func @transform_2(%arg0: i32) -> (i32, i32) {
    %c0_i32 = arith.constant 0 : i32
    %c0_i32_0 = arith.constant 0 : i32
    %c0_i32_1 = arith.constant 0 : i32
    return %c0_i32, %c0_i32_0 : i32, i32
  }
  func.func @transform_3(%arg0: i32) -> (i32, i32) {
    %c0_i32 = arith.constant 0 : i32
    %c0_i32_0 = arith.constant 0 : i32
    %c0_i32_1 = arith.constant 0 : i32
    return %c0_i32, %c0_i32_0 : i32, i32
  }
  func.func @transform_4(%arg0: i32) -> (i32, i32) {
    %c0_i32 = arith.constant 0 : i32
    %c0_i32_0 = arith.constant 0 : i32
    %c0_i32_1 = arith.constant 0 : i32
    return %c0_i32, %c0_i32_0 : i32, i32
  }
  func.func @transform_5(%arg0: i32) -> (i32, i32) {
    %c0_i32 = arith.constant 0 : i32
    %c0_i32_0 = arith.constant 0 : i32
    %c0_i32_1 = arith.constant 0 : i32
    return %c0_i32, %c0_i32_0 : i32, i32
  }
  func.func @transform_6(%arg0: i32) -> (i32, i32) {
    %c0_i32 = arith.constant 0 : i32
    %c0_i32_0 = arith.constant 0 : i32
    %c0_i32_1 = arith.constant 0 : i32
    return %c0_i32, %c0_i32_0 : i32, i32
  }
  func.func @transform_7(%arg0: i32) -> (i32, i32) {
    %c0_i32 = arith.constant 0 : i32
    %c0_i32_0 = arith.constant 0 : i32
    %c0_i32_1 = arith.constant 0 : i32
    return %c0_i32, %c0_i32_0 : i32, i32
  }
  func.func @transform_8(%arg0: i32) -> (i32, i32) {
    %c0_i32 = arith.constant 0 : i32
    %c0_i32_0 = arith.constant 0 : i32
    %c0_i32_1 = arith.constant 0 : i32
    return %c0_i32, %c0_i32_0 : i32, i32
  }
  func.func @transform_9(%arg0: i32) -> (i32, i32) {
    %c0_i32 = arith.constant 0 : i32
    %c0_i32_0 = arith.constant 0 : i32
    %c0_i32_1 = arith.constant 0 : i32
    return %c0_i32, %c0_i32_0 : i32, i32
  }
  func.func @transform_10(%arg0: i32) -> (i32, i32) {
    %c0_i32 = arith.constant 0 : i32
    %c0_i32_0 = arith.constant 0 : i32
    %c0_i32_1 = arith.constant 0 : i32
    return %c0_i32, %c0_i32_0 : i32, i32
  }
  func.func @transform_11(%arg0: i32) -> (i32, i32) {
    %c0_i32 = arith.constant 0 : i32
    %c0_i32_0 = arith.constant 0 : i32
    return %c0_i32, %arg0 : i32, i32
  }
}

</mosaic_0001>

<bundles_post_ra>
// kernel: tpu_custom_call.1
= control target key start
LH: loop header
LB: loop body
LE: loop exit
PB: predicated region body
PF: predicated region fallthrough
CT: control target
= control target key end

     0   :  { %vm99_vm0 = vcmask 130048   ;;  %s1913_s0 = inlined_call_operand.vmem [shape: f32[128,16], index: 0, kind: input, shape index: {}]   ;;  %s1914_s1 = inlined_call_operand.vmem [shape: f32[128,16], index: 1, kind: input, shape index: {}]   ;;  %s1915_s2 = inlined_call_operand.vmem [shape: bf16[16,128], index: 2, kind: input, shape index: {}]   ;;  %s1916_s3 = inlined_call_operand.vmem [shape: bf16[16,128], index: 3, kind: input, shape index: {}]   ;;  %s1917_s4 = inlined_call_operand.vmem [shape: f32[1,128], index: 4, kind: input, shape index: {}]   ;;  %s1918_s5 = inlined_call_operand.vmem [shape: bf16[128,128], index: 5, kind: input, shape index: {}]   ;;  %s1919_s6 = inlined_call_operand.vmem [shape: f32[1,128], index: 6, kind: input, shape index: {}]   ;;  %s1920_s7 = inlined_call_operand.vmem [shape: bf16[128,128], index: 7, kind: input, shape index: {}]   ;;  %s1921_s8 = inlined_call_operand.vmem [shape: f32[1,128], index: 8, kind: input, shape index: {}]   ;;  %s1922_s9 = inlined_call_operand.vmem [shape: bf16[1,128], index: 9, kind: input, shape index: {}]   ;;  %s1923_s10 = inlined_call_operand.<no memory space> [shape: f32[1,1], index: 10, kind: input, shape index: {}]   ;;  %s1924_s11 = inlined_call_operand.hbm [shape: f32[1,128], index: 11, kind: output, shape index: {}]  }
   0x1   :  { %v1344_v0 = vld [vmem:[%s1916_s3] sm:$0xff]   ;;  %v68_v3 = vld [vmem:[%s1914_s1 + $0x8] sm:$0xff]  ;;  %v69_v7 = vld [vmem:[%s1914_s1 + $0x10] sm:$0xff] }
   0x2   :  { %v1345_v1 = vld [vmem:[%s1915_s2] sm:$0xff]   ;;  %1221 = vmatprep.subr.bf16.mxu0 %v1344_v0  ;;  %v42_v6 = vld [vmem:[%s1913_s0 + $0x8] sm:$0xff]  ;;  %v70_v8 = vld [vmem:[%s1914_s1 + $0x18] sm:$0xff] }
   0x3   :  { %v67_v2 = vld [vmem:[%s1914_s1] sm:$0xff]  ;;  %1239 = vmatprep.subr.bf16.mxu1 %v1345_v1  ;;  %1222 = vmatpush3.bf16.msra.mxu0 %v1344_v0  ;;  %v84_v10 = vpack.c.bf16 %v70_v8, %v69_v7  ;;  %v43_v11 = vld [vmem:[%s1913_s0 + $0x10] sm:$0xff]  ;;  %v44_v12 = vld [vmem:[%s1913_s0 + $0x18] sm:$0xff] }
   0x4   :  { %v41_v4 = vld [vmem:[%s1913_s0] sm:$0xff]  ;;  %v83_v5 = vpack.c.bf16 %v68_v3, %v67_v2  ;;  %1240 = vmatpush3.bf16.msra.mxu1 %v1345_v1  ;;  %v58_v14 = vpack.c.bf16 %v44_v12, %v43_v11  ;;  %v72_v15 = vld [vmem:[%s1914_s1 + $0x28] sm:$0xff]  ;;  %v73_v20 = vld [vmem:[%s1914_s1 + $0x30] sm:$0xff] }
   0x5   :  { %v57_v9 = vpack.c.bf16 %v42_v6, %v41_v4  ;;  %v71_v13 = vld [vmem:[%s1914_s1 + $0x20] sm:$0xff]  ;;  %v46_v17 = vld [vmem:[%s1913_s0 + $0x28] sm:$0xff]  ;;  %v74_v21 = vld [vmem:[%s1914_s1 + $0x38] sm:$0xff] }
   0x6   :  { %1223 = vmatprep.mubr.msk.bf16.mxu0 %vm99_vm0, %v83_v5  ;;  %v45_v16 = vld [vmem:[%s1913_s0 + $0x20] sm:$0xff]  ;;  %v85_v18 = vpack.c.bf16 %v72_v15, %v71_v13  ;;  %v47_v22 = vld [vmem:[%s1913_s0 + $0x30] sm:$0xff]  ;;  %v48_v23 = vld [vmem:[%s1913_s0 + $0x38] sm:$0xff]  ;;  %v86_v28 = vpack.c.bf16 %v74_v21, %v73_v20 }
   0x7   :  { %1241 = vmatprep.mubr.msk.bf16.mxu1 %vm99_vm0, %v57_v9  ;;  %1224 = vmatmul.mubr.msk.bf16.vlgmr.msra.gmra.mxu0 %vm99_vm0, %v84_v10  ;;  %v59_v19 = vpack.c.bf16 %v46_v17, %v45_v16  ;;  %v75_v24 = vld [vmem:[%s1914_s1 + $0x40] sm:$0xff]  ;;  %v76_v25 = vld [vmem:[%s1914_s1 + $0x48] sm:$0xff]  ;;  %v60_v29 = vpack.c.bf16 %v48_v23, %v47_v22  ;;  %v77_v32 = vld [vmem:[%s1914_s1 + $0x50] sm:$0xff] }
   0x8   :  { %1242 = vmatmul.mubr.msk.bf16.vlgmr.msra.gmra.mxu1 %vm99_vm0, %v58_v14  ;;  %1227 = vmatprep.mubr.msk.bf16.mxu0 %vm99_vm0, %v85_v18  ;;  %v49_v26 = vld [vmem:[%s1913_s0 + $0x40] sm:$0xff]  ;;  %v50_v27 = vld [vmem:[%s1913_s0 + $0x48] sm:$0xff]  ;;  %v87_v30 = vpack.c.bf16 %v76_v25, %v75_v24  ;;  %v78_v33 = vld [vmem:[%s1914_s1 + $0x58] sm:$0xff] }
   0x9   :  { %1245 = vmatprep.mubr.msk.bf16.mxu1 %vm99_vm0, %v59_v19  ;;  %v61_v31 = vpack.c.bf16 %v50_v27, %v49_v26  ;;  %v51_v34 = vld [vmem:[%s1913_s0 + $0x50] sm:$0xff]  ;;  %v52_v35 = vld [vmem:[%s1913_s0 + $0x58] sm:$0xff]  ;;  %v79_v36 = vld [vmem:[%s1914_s1 + $0x60] sm:$0xff]  ;;  %v88_v40 = vpack.c.bf16 %v78_v33, %v77_v32 }
   0xa   :  { %v80_v37 = vld [vmem:[%s1914_s1 + $0x68] sm:$0xff]  ;;  %v53_v38 = vld [vmem:[%s1913_s0 + $0x60] sm:$0xff]  ;;  %v62_v41 = vpack.c.bf16 %v52_v35, %v51_v34  ;;  %v81_v44 = vld [vmem:[%s1914_s1 + $0x70] sm:$0xff] }
   0xb   :  { %v54_v39 = vld [vmem:[%s1913_s0 + $0x68] sm:$0xff]  ;;  %v89_v42 = vpack.c.bf16 %v80_v37, %v79_v36  ;;  %v82_v45 = vld [vmem:[%s1914_s1 + $0x78] sm:$0xff] }
   0xc   :  { %v63_v43 = vpack.c.bf16 %v54_v39, %v53_v38 }
   0xf   :  { %1228 = vmatmul.mubr.msk.bf16.gmra.mxu0 %vm99_vm0, %v86_v28 }
  0x10   :  { %1246 = vmatmul.mubr.msk.bf16.gmra.mxu1 %vm99_vm0, %v60_v29  ;;  %1231 = vmatprep.mubr.msk.bf16.mxu0 %vm99_vm0, %v87_v30 }
  0x11   :  { %1249 = vmatprep.mubr.msk.bf16.mxu1 %vm99_vm0, %v61_v31 }
  0x17   :  { %1232 = vmatmul.mubr.msk.bf16.gmra.mxu0 %vm99_vm0, %v88_v40 }
  0x18   :  { %1250 = vmatmul.mubr.msk.bf16.gmra.mxu1 %vm99_vm0, %v62_v41  ;;  %1235 = vmatprep.mubr.msk.bf16.mxu0 %vm99_vm0, %v89_v42 }
  0x19   :  { %17 = vsyncpa [#allocation4], 0  ;;  %1253 = vmatprep.mubr.msk.bf16.mxu1 %vm99_vm0, %v63_v43  ;;  %v55_v46 = vld [vmem:[%s1913_s0 + $0x70] sm:$0xff]  ;;  %v56_v47 = vld [vmem:[%s1913_s0 + $0x78] sm:$0xff]  ;;  %v90_v48 = vpack.c.bf16 %v82_v45, %v81_v44  ;;  %vm1577_vm1 = vmmov 0   ;;  %s1578_s13 = smov [#allocation3]  }
  0x1a   :  { %v64_v49 = vpack.c.bf16 %v56_v47, %v55_v46  ;;  %v1346_v50 = vld [vmem:[%s1918_s5 + $0x38] sm:$0xff]   ;;  %v1347_v51 = vld [vmem:[%s1918_s5 + $0x30] sm:$0xff]   ;;  %v1348_v52 = vld [vmem:[%s1918_s5 + $0x28] sm:$0xff]   ;;  %s1069_s14 = sshll.u32 %s1578_s13, 4  ;;  %s1070_s14 = int_to_ptr.vmem [resolvable:$true] %s1069_s14 }
  0x1b   :  { %1257 = vmatprep.subr.bf16.mxu1 %v1346_v50  ;;  %v1349_v53 = vld [vmem:[%s1918_s5 + $0x20] sm:$0xff]   ;;  %v1350_v54 = vld [vmem:[%s1918_s5 + $0x18] sm:$0xff]   ;;  %v1351_v55 = vld [vmem:[%s1918_s5 + $0x10] sm:$0xff]   ;;  %s1554_s15 = scalar_lea.vmem %s1070_s14, 16  ;;  %s1558_s16 = scalar_lea.vmem %s1070_s14, 32 }
  0x1c   :  { %1258 = vmatpush3.bf16.msra.mxu1 %v1346_v50  ;;  %v1352_v56 = vld [vmem:[%s1918_s5 + $0x8] sm:$0xff]   ;;  %v1353_v57 = vld [vmem:[%s1918_s5] sm:$0xff]   ;;  %p1555_p0 = scmp.ne.s32.totalorder %s1070_s14, %s1554_s15  ;;  %p1559_p1 = scmp.lt.s32.totalorder %s1070_s14, %s1070_s14 }
  0x1d   :  { %1259 = vmatprep.subr.bf16.mxu1 %v1347_v51  ;;  %v1784_v60 = vld [vmem:[%s1917_s4] ss:$0 sm:$0xff]  ;;  %p1560_p2 = scmp.lt.s32.totalorder %s1558_s16, %s1554_s15 }
  0x1f   :  { %1236 = vmatmul.mubr.msk.bf16.gmra.mxu0 %vm99_vm0, %v90_v48  ;;  %p1561_p3 = por %p1560_p2, %p1559_p1 }
  0x20   :  { %1254 = vmatmul.mubr.msk.bf16.gmra.mxu1 %vm99_vm0, %v64_v49 }
  0x21   :  { %1260 = vmatpush3.bf16.msra.mxu1 %v1347_v51  ;;  %p1562_p4 = pnand %p1561_p3, %p1555_p0 }
  0x22   :  { %1261 = vmatprep.subr.bf16.mxu1 %v1348_v52 }
  0x25   :  { %1262 = vmatpush3.bf16.msra.mxu1 %v1348_v52 }
  0x26   :  { %1263 = vmatprep.subr.bf16.mxu1 %v1349_v53 }
  0x29   :  { %1264 = vmatpush3.bf16.msra.mxu1 %v1349_v53 }
  0x2a   :  { %1265 = vmatprep.subr.bf16.mxu1 %v1350_v54 }
  0x2d   :  { %1266 = vmatpush3.bf16.msra.mxu1 %v1350_v54 }
  0x2e   :  { %1267 = vmatprep.subr.bf16.mxu1 %v1351_v55 }
  0x31   :  { %1268 = vmatpush3.bf16.msra.mxu1 %v1351_v55 }
  0x32   :  { %1269 = vmatprep.subr.bf16.mxu1 %v1352_v56 }
  0x35   :  { %1270 = vmatpush3.bf16.msra.mxu1 %v1352_v56 }
  0x36   :  { %1271 = vmatprep.subr.bf16.mxu1 %v1353_v57 }
  0x39   :  { %1272 = vmatpush3.bf16.msra.mxu1 %v1353_v57 }
  0xc7   :  { %v1225_v58 = vpop.f32.mrf.mxu0 }
  0xc8   :  { %v1243_v59 = vpop.f32.mrf.mxu1 }
  0xc9   :  { %v294_v61 = vadd.f32 %v1243_v59, %v1225_v58  ;;  %v158_v62 = vpop.f32.mrf.mxu0 }
  0xca   :  { %v285_v63 = vpop.f32.mrf.mxu1 }
  0xcb   :  { %v357_v0 = vadd.f32 %v1784_v60, %v294_v61  ;;  %v286_v1 = vadd.f32 %v285_v63, %v158_v62  ;;  %v1226_v2 = vpop.f32.mrf.mxu0 }
  0xcc   :  { %v1244_v3 = vpop.f32.mrf.mxu1 }
  0xcd   :  { %v1098_v4 = vmul.f32 -1.442695, %v357_v0  ;;  %v355_v5 = vadd.f32 %v1784_v60, %v286_v1  ;;  %v297_v6 = vadd.f32 %v1244_v3, %v1226_v2  ;;  %v161_v7 = vpop.f32.mrf.mxu0 }
  0xce   :  { %v288_v8 = vpop.f32.mrf.mxu1 }
  0xcf   :  { %1362 = vpow2.f32 %v1098_v4  ;;  %v1096_v9 = vmul.f32 -1.442695, %v355_v5  ;;  %v358_v10 = vadd.f32 %v1784_v60, %v297_v6  ;;  %v289_v11 = vadd.f32 %v288_v8, %v161_v7  ;;  %v1229_v12 = vpop.f32.mrf.mxu0 }
  0xd0   :  { %v1247_v13 = vpop.f32.mrf.mxu1 }
  0xd1   :  { %1364 = vpow2.f32 %v1096_v9  ;;  %v1099_v14 = vmul.f32 -1.442695, %v358_v10  ;;  %v356_v15 = vadd.f32 %v1784_v60, %v289_v11  ;;  %v310_v16 = vadd.f32 %v1247_v13, %v1229_v12  ;;  %v174_v17 = vpop.f32.mrf.mxu0 }
  0xd2   :  { %v301_v18 = vpop.f32.mrf.mxu1 }
  0xd3   :  { %1366 = vpow2.f32 %v1099_v14  ;;  %v1097_v19 = vmul.f32 -1.442695, %v356_v15  ;;  %v361_v20 = vadd.f32 %v1784_v60, %v310_v16  ;;  %v302_v21 = vadd.f32 %v301_v18, %v174_v17  ;;  %v1230_v22 = vpop.f32.mrf.mxu0 }
  0xd4   :  { %v1248_v23 = vpop.f32.mrf.mxu1 }
  0xd5   :  { %1368 = vpow2.f32 %v1097_v19  ;;  %v1102_v24 = vmul.f32 -1.442695, %v361_v20  ;;  %v359_v25 = vadd.f32 %v1784_v60, %v302_v21  ;;  %v313_v26 = vadd.f32 %v1248_v23, %v1230_v22  ;;  %v177_v27 = vpop.f32.mrf.mxu0 }
  0xd6   :  { %v304_v28 = vpop.f32.mrf.mxu1 }
  0xd7   :  { %1370 = vpow2.f32 %v1102_v24  ;;  %v1100_v29 = vmul.f32 -1.442695, %v359_v25  ;;  %v362_v30 = vadd.f32 %v1784_v60, %v313_v26  ;;  %v305_v31 = vadd.f32 %v304_v28, %v177_v27  ;;  %v1233_v32 = vpop.f32.mrf.mxu0 }
  0xd8   :  { %v1251_v33 = vpop.f32.mrf.mxu1 }
  0xd9   :  { %1372 = vpow2.f32 %v1100_v29  ;;  %v1103_v34 = vmul.f32 -1.442695, %v362_v30  ;;  %v360_v35 = vadd.f32 %v1784_v60, %v305_v31  ;;  %v326_v36 = vadd.f32 %v1251_v33, %v1233_v32  ;;  %v190_v37 = vpop.f32.mrf.mxu0 }
  0xda   :  { %v317_v38 = vpop.f32.mrf.mxu1 }
  0xdb   :  { %1374 = vpow2.f32 %v1103_v34  ;;  %v1101_v39 = vmul.f32 -1.442695, %v360_v35  ;;  %v365_v40 = vadd.f32 %v1784_v60, %v326_v36  ;;  %v318_v41 = vadd.f32 %v317_v38, %v190_v37  ;;  %v1234_v42 = vpop.f32.mrf.mxu0 }
  0xdc   :  { %v1363_v43 = vpop.eup %1362  ;;  %v1252_v44 = vpop.f32.mrf.mxu1 }
  0xdd   :  { %v421_v45 = vadd.f32 1.0, %v1363_v43  ;;  %1376 = vpow2.f32 %v1101_v39  ;;  %v1106_v46 = vmul.f32 -1.442695, %v365_v40  ;;  %v363_v47 = vadd.f32 %v1784_v60, %v318_v41  ;;  %v193_v48 = vpop.f32.mrf.mxu0 }
  0xde   :  { %v1365_v49 = vpop.eup %1364  ;;  %v329_v50 = vadd.f32 %v1252_v44, %v1234_v42  ;;  %v320_v51 = vpop.f32.mrf.mxu1 }
  0xdf   :  { %1378 = vrcp.f32 %v421_v45  ;;  %v419_v52 = vadd.f32 1.0, %v1365_v49  ;;  %v1104_v53 = vmul.f32 -1.442695, %v363_v47  ;;  %v321_v54 = vadd.f32 %v320_v51, %v193_v48  ;;  %v1237_v55 = vpop.f32.mrf.mxu0 }
  0xe0   :  { %v1367_v56 = vpop.eup %1366  ;;  %1380 = vpow2.f32 %v1106_v46  ;;  %v366_v57 = vadd.f32 %v1784_v60, %v329_v50  ;;  %v1255_v58 = vpop.f32.mrf.mxu1 }
  0xe1   :  { %1382 = vrcp.f32 %v419_v52  ;;  %v422_v59 = vadd.f32 1.0, %v1367_v56  ;;  %v364_v61 = vadd.f32 %v1784_v60, %v321_v54  ;;  %v342_v62 = vadd.f32 %v1255_v58, %v1237_v55  ;;  %v206_v63 = vpop.f32.mrf.mxu0 }
  0xe2   :  { %v1369_v0 = vpop.eup %1368  ;;  %1384 = vpow2.f32 %v1104_v53  ;;  %v1107_v1 = vmul.f32 -1.442695, %v366_v57  ;;  %v333_v2 = vpop.f32.mrf.mxu1 }
  0xe3   :  { %1386 = vrcp.f32 %v422_v59  ;;  %v420_v3 = vadd.f32 1.0, %v1369_v0  ;;  %v1105_v4 = vmul.f32 -1.442695, %v364_v61  ;;  %v369_v5 = vadd.f32 %v1784_v60, %v342_v62  ;;  %v1238_v6 = vpop.f32.mrf.mxu0 }
  0xe4   :  { %v1371_v7 = vpop.eup %1370  ;;  %1388 = vpow2.f32 %v1107_v1  ;;  %v334_v8 = vadd.f32 %v333_v2, %v206_v63  ;;  %v1256_v9 = vpop.f32.mrf.mxu1 }
  0xe5   :  { %1390 = vrcp.f32 %v420_v3  ;;  %v425_v10 = vadd.f32 1.0, %v1371_v7  ;;  %v1110_v11 = vmul.f32 -1.442695, %v369_v5  ;;  %v345_v12 = vadd.f32 %v1256_v9, %v1238_v6  ;;  %v209_v13 = vpop.f32.mrf.mxu0  ;;  %v1355_v5 = vld [vmem:[%s1920_s7 + $0x30] sm:$0xff]   ;;  %v1356_v6 = vld [vmem:[%s1920_s7 + $0x28] sm:$0xff]   ;;  %v1357_v7 = vld [vmem:[%s1920_s7 + $0x20] sm:$0xff]  }
  0xe6   :  { %v1373_v14 = vpop.eup %1372  ;;  %1392 = vpow2.f32 %v1105_v4  ;;  %v367_v15 = vadd.f32 %v1784_v60, %v334_v8  ;;  %v336_v16 = vpop.f32.mrf.mxu1  ;;  %v1354_v4 = vld [vmem:[%s1920_s7 + $0x38] sm:$0xff]   ;;  %v1359_v9 = vld [vmem:[%s1920_s7 + $0x10] sm:$0xff]  }
  0xe7   :  { %1394 = vrcp.f32 %v425_v10  ;;  %v423_v17 = vadd.f32 1.0, %v1373_v14  ;;  %v370_v18 = vadd.f32 %v1784_v60, %v345_v12  ;;  %v337_v19 = vadd.f32 %v336_v16, %v209_v13  ;;  %1289 = vmatprep.subr.bf16.mxu1 %v1354_v4  ;;  %v1358_v8 = vld [vmem:[%s1920_s7 + $0x18] sm:$0xff]   ;;  %v1360_v10 = vld [vmem:[%s1920_s7 + $0x8] sm:$0xff]   ;;  %v1829_v12 = vld [vmem:[%s1919_s6] ss:$0 sm:$0xff] }
  0xe8   :  { %v1375_v20 = vpop.eup %1374  ;;  %1396 = vpow2.f32 %v1110_v11  ;;  %v1108_v21 = vmul.f32 -1.442695, %v367_v15  ;;  %v1361_v11 = vld [vmem:[%s1920_s7] sm:$0xff]  }
  0xe9   :  { %1398 = vrcp.f32 %v423_v17  ;;  %v426_v22 = vadd.f32 1.0, %v1375_v20  ;;  %v1111_v23 = vmul.f32 -1.442695, %v370_v18  ;;  %v368_v24 = vadd.f32 %v1784_v60, %v337_v19 }
  0xea   :  { %v1377_v25 = vpop.eup %1376  ;;  %1400 = vpow2.f32 %v1108_v21 }
  0xeb   :  { %1402 = vrcp.f32 %v426_v22  ;;  %v424_v26 = vadd.f32 1.0, %v1377_v25  ;;  %v1109_v27 = vmul.f32 -1.442695, %v368_v24 }
  0xec   :  { %v1379_v28 = vpop.eup %1378  ;;  %1404 = vpow2.f32 %v1111_v23 }
  0xed   :  { %v1381_v29 = vpop.eup %1380  ;;  %1406 = vrcp.f32 %v424_v26 }
  0xee   :  { %v1383_v30 = vpop.eup %1382  ;;  %1408 = vpow2.f32 %v1109_v27  ;;  %v429_v38 = vadd.f32 1.0, %v1381_v29 }
  0xef   :  { %v1385_v31 = vpop.eup %1384 }
  0xf0   :  { %v1387_v32 = vpop.eup %1386  ;;  %v427_v33 = vadd.f32 1.0, %v1385_v31 }
  0xf1   :  { %v1389_v34 = vpop.eup %1388  ;;  %v468_v41 = vpack.c.bf16 %v1387_v32, %v1379_v28 }
  0xf2   :  { %v1391_v35 = vpop.eup %1390  ;;  %v430_v36 = vadd.f32 1.0, %v1389_v34  ;;  %1410 = vrcp.f32 %v427_v33 }
  0xf3   :  { %v1393_v37 = vpop.eup %1392  ;;  %v467_v60 = vpack.c.bf16 %v1391_v35, %v1383_v30 }
  0xf4   :  { %v1395_v39 = vpop.eup %1394  ;;  %v428_v40 = vadd.f32 1.0, %v1393_v37  ;;  %1412 = vrcp.f32 %v430_v36 }
  0xf5   :  { %v1397_v42 = vpop.eup %1396  ;;  %1273 = vmatprep.mubr.bf16.mxu1 %v467_v60 }
  0xf6   :  { %v1399_v43 = vpop.eup %1398  ;;  %1414 = vrcp.f32 %v428_v40  ;;  %1274 = vmatmul.mubr.bf16.vlgmr.msra.gmra.mxu1 %v468_v41  ;;  %v433_v51 = vadd.f32 1.0, %v1397_v42 }
  0xf7   :  { %v1401_v44 = vpop.eup %1400  ;;  %1416 = vrcp.f32 %v429_v38  ;;  %1290 = vmatpush3.bf16.msra.mxu1 %v1354_v4 }
  0xf8   :  { %v1403_v45 = vpop.eup %1402  ;;  %v431_v46 = vadd.f32 1.0, %v1401_v44  ;;  %1291 = vmatprep.subr.bf16.mxu1 %v1355_v5 }
  0xf9   :  { %v1405_v47 = vpop.eup %1404  ;;  %v470_v54 = vpack.c.bf16 %v1403_v45, %v1395_v39 }
  0xfa   :  { %v1407_v48 = vpop.eup %1406  ;;  %v434_v49 = vadd.f32 1.0, %v1405_v47  ;;  %1418 = vrcp.f32 %v431_v46 }
  0xfb   :  { %v1409_v50 = vpop.eup %1408  ;;  %v469_v52 = vpack.c.bf16 %v1407_v48, %v1399_v43  ;;  %1292 = vmatpush3.bf16.msra.mxu1 %v1355_v5 }
  0xfc   :  { %v432_v53 = vadd.f32 1.0, %v1409_v50  ;;  %1420 = vrcp.f32 %v434_v49  ;;  %1293 = vmatprep.subr.bf16.mxu1 %v1356_v6 }
  0xfd   :  { %1277 = vmatprep.mubr.bf16.mxu1 %v469_v52 }
  0xfe   :  { %1422 = vrcp.f32 %v432_v53  ;;  %1278 = vmatmul.mubr.bf16.gmra.mxu1 %v470_v54 }
  0xff   :  { %1424 = vrcp.f32 %v433_v51  ;;  %v1411_v55 = vpop.eup %1410  ;;  %1294 = vmatpush3.bf16.msra.mxu1 %v1356_v6 }
 0x100   :  { %1295 = vmatprep.subr.bf16.mxu1 %v1357_v7 }
 0x101   :  { %v1413_v56 = vpop.eup %1412 }
 0x103   :  { %v1415_v57 = vpop.eup %1414  ;;  %1296 = vmatpush3.bf16.msra.mxu1 %v1357_v7 }
 0x104   :  { %v1417_v58 = vpop.eup %1416  ;;  %v471_v59 = vpack.c.bf16 %v1415_v57, %v1411_v55  ;;  %1297 = vmatprep.subr.bf16.mxu1 %v1358_v8 }
 0x105   :  { %v472_v61 = vpack.c.bf16 %v1413_v56, %v1417_v58 }
 0x106   :  { %1281 = vmatprep.mubr.bf16.mxu1 %v471_v59 }
 0x107   :  { %1282 = vmatmul.mubr.bf16.gmra.mxu1 %v472_v61  ;;  %v1419_v62 = vpop.eup %1418 }
 0x108   :  { %1298 = vmatpush3.bf16.msra.mxu1 %v1358_v8 }
 0x109   :  { %v1421_v63 = vpop.eup %1420  ;;  %1299 = vmatprep.subr.bf16.mxu1 %v1359_v9 }
 0x10b   :  { %v1423_v0 = vpop.eup %1422 }
 0x10c   :  { %v1425_v1 = vpop.eup %1424  ;;  %v473_v2 = vpack.c.bf16 %v1423_v0, %v1419_v62  ;;  %1300 = vmatpush3.bf16.msra.mxu1 %v1359_v9 }
 0x10d   :  { %v474_v3 = vpack.c.bf16 %v1421_v63, %v1425_v1  ;;  %1301 = vmatprep.subr.bf16.mxu1 %v1360_v10 }
 0x10e   :  { %1285 = vmatprep.mubr.bf16.mxu1 %v473_v2 }
 0x10f   :  { %1286 = vmatmul.mubr.bf16.gmra.mxu1 %v474_v3 }
 0x110   :  { %1302 = vmatpush3.bf16.msra.mxu1 %v1360_v10 }
 0x111   :  { %1303 = vmatprep.subr.bf16.mxu1 %v1361_v11 }
 0x114   :  { %1304 = vmatpush3.bf16.msra.mxu1 %v1361_v11 }
 0x1b6   :  { %v1275_v13 = vpop.f32.mrf.mxu1 }
 0x1b7   :  { %v589_v14 = vadd.f32 %v1275_v13, %v1829_v12 }
 0x1b8   :  { %v580_v15 = vpop.f32.mrf.mxu1 }
 0x1b9   :  { %v1123_v16 = vmul.f32 -1.442695, %v589_v14  ;;  %v581_v17 = vadd.f32 %v1829_v12, %v580_v15 }
 0x1ba   :  { %v1276_v18 = vpop.f32.mrf.mxu1 }
 0x1bb   :  { %1426 = vpow2.f32 %v1123_v16  ;;  %v1121_v19 = vmul.f32 -1.442695, %v581_v17  ;;  %v592_v20 = vadd.f32 %v1276_v18, %v1829_v12 }
 0x1bc   :  { %v583_v21 = vpop.f32.mrf.mxu1 }
 0x1bd   :  { %1428 = vpow2.f32 %v1121_v19  ;;  %v1124_v22 = vmul.f32 -1.442695, %v592_v20  ;;  %v584_v23 = vadd.f32 %v1829_v12, %v583_v21 }
 0x1be   :  { %v1279_v24 = vpop.f32.mrf.mxu1 }
 0x1bf   :  { %1430 = vpow2.f32 %v1124_v22  ;;  %v1122_v25 = vmul.f32 -1.442695, %v584_v23  ;;  %v605_v26 = vadd.f32 %v1279_v24, %v1829_v12 }
 0x1c0   :  { %v596_v27 = vpop.f32.mrf.mxu1 }
 0x1c1   :  { %1432 = vpow2.f32 %v1122_v25  ;;  %v1127_v28 = vmul.f32 -1.442695, %v605_v26  ;;  %v597_v29 = vadd.f32 %v1829_v12, %v596_v27 }
 0x1c2   :  { %v1280_v30 = vpop.f32.mrf.mxu1 }
 0x1c3   :  { %1434 = vpow2.f32 %v1127_v28  ;;  %v1125_v31 = vmul.f32 -1.442695, %v597_v29  ;;  %v608_v32 = vadd.f32 %v1280_v30, %v1829_v12 }
 0x1c4   :  { %v599_v33 = vpop.f32.mrf.mxu1 }
 0x1c5   :  { %1436 = vpow2.f32 %v1125_v31  ;;  %v1128_v34 = vmul.f32 -1.442695, %v608_v32  ;;  %v600_v35 = vadd.f32 %v1829_v12, %v599_v33 }
 0x1c7   :  { %1438 = vpow2.f32 %v1128_v34  ;;  %v1126_v36 = vmul.f32 -1.442695, %v600_v35  ;;  %v1283_v37 = vpop.f32.mrf.mxu1 }
 0x1c8   :  { %v1427_v38 = vpop.eup %1426  ;;  %v621_v60 = vadd.f32 %v1283_v37, %v1829_v12 }
 0x1c9   :  { %v693_v39 = vadd.f32 1.0, %v1427_v38  ;;  %1440 = vpow2.f32 %v1126_v36  ;;  %v612_v40 = vpop.f32.mrf.mxu1 }
 0x1ca   :  { %v1429_v41 = vpop.eup %1428  ;;  %v1131_v42 = vmul.f32 -1.442695, %v621_v60  ;;  %v613_v43 = vadd.f32 %v1829_v12, %v612_v40 }
 0x1cb   :  { %1442 = vrcp.f32 %v693_v39  ;;  %v691_v44 = vadd.f32 1.0, %v1429_v41  ;;  %v1284_v45 = vpop.f32.mrf.mxu1 }
 0x1cc   :  { %v1431_v46 = vpop.eup %1430  ;;  %1444 = vpow2.f32 %v1131_v42  ;;  %v1129_v47 = vmul.f32 -1.442695, %v613_v43  ;;  %v624_v48 = vadd.f32 %v1284_v45, %v1829_v12 }
 0x1cd   :  { %1446 = vrcp.f32 %v691_v44  ;;  %v694_v49 = vadd.f32 1.0, %v1431_v46  ;;  %v615_v50 = vpop.f32.mrf.mxu1 }
 0x1ce   :  { %v1433_v51 = vpop.eup %1432  ;;  %1448 = vpow2.f32 %v1129_v47  ;;  %v1132_v52 = vmul.f32 -1.442695, %v624_v48  ;;  %v616_v53 = vadd.f32 %v1829_v12, %v615_v50 }
 0x1cf   :  { %1450 = vrcp.f32 %v694_v49  ;;  %v692_v54 = vadd.f32 1.0, %v1433_v51  ;;  %v1287_v55 = vpop.f32.mrf.mxu1 }
 0x1d0   :  { %v1435_v56 = vpop.eup %1434  ;;  %1452 = vpow2.f32 %v1132_v52  ;;  %v1130_v57 = vmul.f32 -1.442695, %v616_v53  ;;  %v637_v58 = vadd.f32 %v1287_v55, %v1829_v12  ;;  %v1576_v52 = vmov 0.0   ;;  %v1852_v53 = vld [vmem:[%s1921_s8] ss:$0 sm:$0xff] }
 0x1d1   :  { %1454 = vrcp.f32 %v692_v54  ;;  %v697_v59 = vadd.f32 1.0, %v1435_v56  ;;  %v628_v61 = vpop.f32.mrf.mxu1  ;;  %1321 = vmatprep.subr.bf16.mxu0 %v1576_v52  ;;  %1337 = vmatprep.mubr.msk.bf16.mxu0 %vm1577_vm1, %v1576_v52 }
 0x1d2   :  { %v1437_v62 = vpop.eup %1436  ;;  %1456 = vpow2.f32 %v1130_v57  ;;  %v1135_v63 = vmul.f32 -1.442695, %v637_v58  ;;  %v629_v0 = vadd.f32 %v1829_v12, %v628_v61 }
 0x1d3   :  { %1458 = vrcp.f32 %v697_v59  ;;  %v695_v1 = vadd.f32 1.0, %v1437_v62  ;;  %v1288_v2 = vpop.f32.mrf.mxu1 }
 0x1d4   :  { %v1439_v3 = vpop.eup %1438  ;;  %1460 = vpow2.f32 %v1135_v63  ;;  %v1133_v4 = vmul.f32 -1.442695, %v629_v0  ;;  %v640_v5 = vadd.f32 %v1288_v2, %v1829_v12 }
 0x1d5   :  { %1462 = vrcp.f32 %v695_v1  ;;  %v698_v6 = vadd.f32 1.0, %v1439_v3  ;;  %v631_v7 = vpop.f32.mrf.mxu1 }
 0x1d6   :  { %v1441_v8 = vpop.eup %1440  ;;  %1464 = vpow2.f32 %v1133_v4  ;;  %v1136_v9 = vmul.f32 -1.442695, %v640_v5  ;;  %v632_v10 = vadd.f32 %v1829_v12, %v631_v7 }
 0x1d7   :  { %1466 = vrcp.f32 %v698_v6  ;;  %v696_v11 = vadd.f32 1.0, %v1441_v8 }
 0x1d8   :  { %v1443_v13 = vpop.eup %1442  ;;  %1468 = vpow2.f32 %v1136_v9  ;;  %v1134_v14 = vmul.f32 -1.442695, %v632_v10 }
 0x1d9   :  { %v1445_v15 = vpop.eup %1444  ;;  %1470 = vrcp.f32 %v696_v11 }
 0x1da   :  { %v1447_v16 = vpop.eup %1446  ;;  %1472 = vpow2.f32 %v1134_v14  ;;  %v701_v24 = vadd.f32 1.0, %v1445_v15 }
 0x1db   :  { %v1449_v17 = vpop.eup %1448 }
 0x1dc   :  { %v1451_v18 = vpop.eup %1450  ;;  %v699_v19 = vadd.f32 1.0, %v1449_v17 }
 0x1dd   :  { %v1453_v20 = vpop.eup %1452  ;;  %v740_v27 = vpack.c.bf16 %v1451_v18, %v1443_v13 }
 0x1de   :  { %v1455_v21 = vpop.eup %1454  ;;  %v702_v22 = vadd.f32 1.0, %v1453_v20  ;;  %1474 = vrcp.f32 %v699_v19 }
 0x1df   :  { %v1457_v23 = vpop.eup %1456  ;;  %v739_v25 = vpack.c.bf16 %v1455_v21, %v1447_v16 }
 0x1e0   :  { %v1459_v26 = vpop.eup %1458  ;;  %v700_v12 = vadd.f32 1.0, %v1457_v23  ;;  %1476 = vrcp.f32 %v702_v22 }
 0x1e1   :  { %v1461_v28 = vpop.eup %1460  ;;  %1305 = vmatprep.mubr.bf16.mxu1 %v739_v25 }
 0x1e2   :  { %v1463_v29 = vpop.eup %1462  ;;  %1478 = vrcp.f32 %v700_v12  ;;  %1306 = vmatmul.mubr.bf16.vlgmr.msra.gmra.mxu1 %v740_v27  ;;  %v705_v37 = vadd.f32 1.0, %v1461_v28 }
 0x1e3   :  { %v1465_v30 = vpop.eup %1464  ;;  %1480 = vrcp.f32 %v701_v24 }
 0x1e4   :  { %v1467_v31 = vpop.eup %1466  ;;  %v703_v32 = vadd.f32 1.0, %v1465_v30 }
 0x1e5   :  { %v1469_v33 = vpop.eup %1468  ;;  %v742_v39 = vpack.c.bf16 %v1467_v31, %v1459_v26 }
 0x1e6   :  { %v1471_v34 = vpop.eup %1470  ;;  %v706_v35 = vadd.f32 1.0, %v1469_v33  ;;  %1482 = vrcp.f32 %v703_v32 }
 0x1e7   :  { %v1473_v36 = vpop.eup %1472  ;;  %v741_v38 = vpack.c.bf16 %v1471_v34, %v1463_v29 }
 0x1e8   :  { %v704_v60 = vadd.f32 1.0, %v1473_v36  ;;  %1484 = vrcp.f32 %v706_v35 }
 0x1e9   :  { %1309 = vmatprep.mubr.bf16.mxu1 %v741_v38 }
 0x1ea   :  { %1486 = vrcp.f32 %v704_v60  ;;  %1310 = vmatmul.mubr.bf16.gmra.mxu1 %v742_v39 }
 0x1eb   :  { %1488 = vrcp.f32 %v705_v37  ;;  %v1475_v40 = vpop.eup %1474 }
 0x1ed   :  { %v1477_v41 = vpop.eup %1476 }
 0x1ef   :  { %v1479_v42 = vpop.eup %1478 }
 0x1f0   :  { %v1481_v43 = vpop.eup %1480  ;;  %v743_v44 = vpack.c.bf16 %v1479_v42, %v1475_v40 }
 0x1f1   :  { %v744_v45 = vpack.c.bf16 %v1477_v41, %v1481_v43 }
 0x1f2   :  { %1313 = vmatprep.mubr.bf16.mxu1 %v743_v44 }
 0x1f3   :  { %1314 = vmatmul.mubr.bf16.gmra.mxu1 %v744_v45  ;;  %v1483_v46 = vpop.eup %1482 }
 0x1f5   :  { %v1485_v47 = vpop.eup %1484 }
 0x1f7   :  { %v1487_v48 = vpop.eup %1486 }
 0x1f8   :  { %v1489_v49 = vpop.eup %1488  ;;  %v745_v50 = vpack.c.bf16 %v1487_v48, %v1483_v46 }
 0x1f9   :  { %v746_v51 = vpack.c.bf16 %v1485_v47, %v1489_v49 }
 0x1fa   :  { %1317 = vmatprep.mubr.bf16.mxu1 %v745_v50 }
 0x1fb   :  { %1318 = vmatmul.mubr.bf16.gmra.mxu1 %v746_v51 }
 0x2a2   :  { %v1307_v54 = vpop.f32.mrf.mxu1 }
 0x2a3   :  { %v861_v55 = vadd.f32 %v1307_v54, %v1852_v53 }
 0x2a4   :  { %v852_v56 = vpop.f32.mrf.mxu1 }
 0x2a5   :  { %v1148_v57 = vmul.f32 -1.442695, %v861_v55  ;;  %v853_v58 = vadd.f32 %v1852_v53, %v852_v56 }
 0x2a6   :  { %v1308_v59 = vpop.f32.mrf.mxu1 }
 0x2a7   :  { %1490 = vpow2.f32 %v1148_v57  ;;  %v1146_v61 = vmul.f32 -1.442695, %v853_v58  ;;  %v864_v62 = vadd.f32 %v1308_v59, %v1852_v53 }
 0x2a8   :  { %v855_v63 = vpop.f32.mrf.mxu1 }
 0x2a9   :  { %1492 = vpow2.f32 %v1146_v61  ;;  %v1149_v0 = vmul.f32 -1.442695, %v864_v62  ;;  %v856_v1 = vadd.f32 %v1852_v53, %v855_v63 }
 0x2aa   :  { %v1858_v2 = vpop.f32.mrf.mxu1 }
 0x2ab   :  { %1494 = vpow2.f32 %v1149_v0  ;;  %v1147_v3 = vmul.f32 -1.442695, %v856_v1  ;;  %v877_v54 = vadd.f32 %v1858_v2, %v1852_v53 }
 0x2ac   :  { %v1860_v4 = vpop.f32.mrf.mxu1 }
 0x2ad   :  { %1496 = vpow2.f32 %v1147_v3  ;;  %v1152_v58 = vmul.f32 -1.442695, %v877_v54  ;;  %v869_v0 = vadd.f32 %v1852_v53, %v1860_v4 }
 0x2ae   :  { %v1312_v5 = vpop.f32.mrf.mxu1 }
 0x2af   :  { %v880_v50 = vadd.f32 %v1312_v5, %v1852_v53 }
 0x2b0   :  { %v1862_v6 = vpop.f32.mrf.mxu1 }
 0x2b1   :  { %v1153_v56 = vmul.f32 -1.442695, %v880_v50  ;;  %v872_v61 = vadd.f32 %v1852_v53, %v1862_v6 }
 0x2b3   :  { %v1315_v7 = vpop.f32.mrf.mxu1  ;;  %v1151_v3 = vmul.f32 -1.442695, %v872_v61 }
 0x2b4   :  { %v1491_v8 = vpop.eup %1490  ;;  %v893_v34 = vadd.f32 %v1315_v7, %v1852_v53 }
 0x2b5   :  { %v884_v9 = vpop.f32.mrf.mxu1  ;;  %v965_v11 = vadd.f32 1.0, %v1491_v8  ;;  %v1150_v8 = vmul.f32 -1.442695, %v869_v0 }
 0x2b6   :  { %v1493_v10 = vpop.eup %1492  ;;  %v1156_v39 = vmul.f32 -1.442695, %v893_v34  ;;  %v885_v43 = vadd.f32 %v1852_v53, %v884_v9  ;;  %v1011_v34 = vld [vmem:[%s1922_s9] sm:$0x1] }
 0x2b7   :  { %v1316_v13 = vpop.f32.mrf.mxu1  ;;  %v963_v15 = vadd.f32 1.0, %v1493_v10  ;;  %1498 = vrcp.f32 %v965_v11 }
 0x2b8   :  { %v1495_v14 = vpop.eup %1494  ;;  %v896_v31 = vadd.f32 %v1316_v13, %v1852_v53  ;;  %v1154_v48 = vmul.f32 -1.442695, %v885_v43 }
 0x2b9   :  { %v966_v16 = vadd.f32 1.0, %v1495_v14  ;;  %v887_v17 = vpop.f32.mrf.mxu1 }
 0x2ba   :  { %v1497_v18 = vpop.eup %1496  ;;  %v1157_v38 = vmul.f32 -1.442695, %v896_v31  ;;  %v888_v41 = vadd.f32 %v1852_v53, %v887_v17 }
 0x2bb   :  { %1500 = vrcp.f32 %v966_v16  ;;  %v964_v19 = vadd.f32 1.0, %v1497_v18  ;;  %v1319_v20 = vpop.f32.mrf.mxu1 }
 0x2bc   :  { %1502 = vrcp.f32 %v963_v15  ;;  %v909_v21 = vadd.f32 %v1319_v20, %v1852_v53  ;;  %v1155_v45 = vmul.f32 -1.442695, %v888_v41 }
 0x2bd   :  { %1504 = vrcp.f32 %v964_v19  ;;  %v900_v22 = vpop.f32.mrf.mxu1 }
 0x2be   :  { %v1160_v23 = vmul.f32 -1.442695, %v909_v21  ;;  %v901_v25 = vadd.f32 %v1852_v53, %v900_v22 }
 0x2bf   :  { %v1320_v24 = vpop.f32.mrf.mxu1 }
 0x2c0   :  { %1506 = vpow2.f32 %v1160_v23  ;;  %v912_v26 = vadd.f32 %v1320_v24, %v1852_v53  ;;  %v1158_v29 = vmul.f32 -1.442695, %v901_v25 }
 0x2c1   :  { %v903_v12 = vpop.f32.mrf.mxu1 }
 0x2c2   :  { %v1161_v27 = vmul.f32 -1.442695, %v912_v26  ;;  %v904_v28 = vadd.f32 %v1852_v53, %v903_v12 }
 0x2c4   :  { %1508 = vpow2.f32 %v1161_v27  ;;  %v1159_v30 = vmul.f32 -1.442695, %v904_v28  ;;  %v1869_v32 = vpop.eup %1498 }
 0x2c6   :  { %1510 = vpow2.f32 %v1159_v30 }
 0x2c7   :  { %1512 = vpow2.f32 %v1158_v29 }
 0x2c8   :  { %v1871_v33 = vpop.eup %1500  ;;  %1514 = vpow2.f32 %v1157_v38  ;;  %v1021_v38 = vstv %s1923_s10 }
 0x2c9   :  { %v1874_v35 = vpop.eup %1502  ;;  %v1013_v36 = vpack.c.bf16 %v1871_v33, %v1869_v32  ;;  %1516 = vpow2.f32 %v1156_v39 }
 0x2ca   :  { %v1878_v37 = vpop.eup %1504 }
 0x2cb   :  { %v1012_v60 = vpack.c.bf16 %v1878_v37, %v1874_v35 }
 0x2cd   :  { %v1507_v40 = vpop.eup %1506 }
 0x2ce   :  { %v977_v42 = vadd.f32 1.0, %v1507_v40 }
 0x2d0   :  { %1518 = vrcp.f32 %v977_v42 }
 0x2d1   :  { %v1509_v44 = vpop.eup %1508 }
 0x2d2   :  { %v978_v46 = vadd.f32 1.0, %v1509_v44 }
 0x2d3   :  { %v1511_v47 = vpop.eup %1510 }
 0x2d4   :  { %1520 = vrcp.f32 %v978_v46  ;;  %v1513_v49 = vpop.eup %1512  ;;  %v976_v51 = vadd.f32 1.0, %v1511_v47 }
 0x2d5   :  { %1522 = vpow2.f32 %v1155_v45  ;;  %v975_v55 = vadd.f32 1.0, %v1513_v49  ;;  %v1515_v57 = vpop.eup %1514 }
 0x2d6   :  { %1524 = vpow2.f32 %v1154_v48  ;;  %v1517_v59 = vpop.eup %1516  ;;  %v974_v62 = vadd.f32 1.0, %v1515_v57 }
 0x2d7   :  { %1526 = vrcp.f32 %v976_v51  ;;  %v973_v1 = vadd.f32 1.0, %v1517_v59 }
 0x2d8   :  { %1528 = vrcp.f32 %v975_v55 }
 0x2d9   :  { %1530 = vpow2.f32 %v1153_v56 }
 0x2da   :  { %1532 = vpow2.f32 %v1152_v58 }
 0x2db   :  { %1534 = vrcp.f32 %v974_v62 }
 0x2dc   :  { %1536 = vrcp.f32 %v973_v1 }
 0x2dd   :  { %v1519_v63 = vpop.eup %1518  ;;  %1538 = vpow2.f32 %v1151_v3 }
 0x2de   :  { %1540 = vpow2.f32 %v1150_v8 }
 0x2e1   :  { %v1521_v2 = vpop.eup %1520 }
 0x2e2   :  { %v1019_v5 = vpack.c.bf16 %v1521_v2, %v1519_v63  ;;  %v1523_v7 = vpop.eup %1522 }
 0x2e3   :  { %v1525_v9 = vpop.eup %1524  ;;  %v972_v6 = vadd.f32 1.0, %v1523_v7 }
 0x2e4   :  { %1322 = vmatpush3.bf16.xpose.msra.mxu0 %v1019_v5  ;;  %v1527_v10 = vpop.eup %1526  ;;  %v971_v11 = vadd.f32 1.0, %v1525_v9 }
 0x2e5   :  { %1323 = vmatprep.subr.bf16.mxu0 %v1576_v52  ;;  %v1529_v13 = vpop.eup %1528  ;;  %1542 = vrcp.f32 %v972_v6 }
 0x2e6   :  { %v1018_v53 = vpack.c.bf16 %v1527_v10, %v1529_v13  ;;  %v1531_v4 = vpop.eup %1530  ;;  %1544 = vrcp.f32 %v971_v11 }
 0x2e7   :  { %v1533_v14 = vpop.eup %1532  ;;  %v970_v15 = vadd.f32 1.0, %v1531_v4 }
 0x2e8   :  { %v1535_v16 = vpop.eup %1534  ;;  %v969_v17 = vadd.f32 1.0, %v1533_v14 }
 0x2e9   :  { %v1537_v18 = vpop.eup %1536  ;;  %1546 = vrcp.f32 %v970_v15 }
 0x2ea   :  { %v1017_v19 = vpack.c.bf16 %v1535_v16, %v1537_v18  ;;  %v1539_v20 = vpop.eup %1538  ;;  %1548 = vrcp.f32 %v969_v17 }
 0x2eb   :  { %v1541_v21 = vpop.eup %1540  ;;  %v968_v22 = vadd.f32 1.0, %v1539_v20 }
 0x2ec   :  { %1324 = vmatpush3.bf16.xpose.msra.mxu0 %v1018_v53  ;;  %v967_v24 = vadd.f32 1.0, %v1541_v21 }
 0x2ed   :  { %1325 = vmatprep.subr.bf16.mxu0 %v1576_v52  ;;  %1550 = vrcp.f32 %v968_v22 }
 0x2ee   :  { %1552 = vrcp.f32 %v967_v24 }
 0x2f2   :  { %v1543_v23 = vpop.eup %1542 }
 0x2f3   :  { %v1545_v25 = vpop.eup %1544 }
 0x2f4   :  { %1326 = vmatpush3.bf16.xpose.msra.mxu0 %v1017_v19  ;;  %v1016_v26 = vpack.c.bf16 %v1543_v23, %v1545_v25 }
 0x2f5   :  { %1327 = vmatprep.subr.bf16.mxu0 %v1576_v52 }
 0x2f6   :  { %v1547_v12 = vpop.eup %1546 }
 0x2f7   :  { %v1549_v27 = vpop.eup %1548 }
 0x2f8   :  { %v1015_v28 = vpack.c.bf16 %v1547_v12, %v1549_v27 }
 0x2fa   :  { %v1551_v29 = vpop.eup %1550 }
 0x2fb   :  { %v1553_v30 = vpop.eup %1552 }
 0x2fc   :  { %1328 = vmatpush3.bf16.xpose.msra.mxu0 %v1016_v26  ;;  %v1014_v31 = vpack.c.bf16 %v1551_v29, %v1553_v30 }
 0x2fd   :  { %1329 = vmatprep.subr.bf16.mxu0 %v1576_v52 }
 0x304   :  { %1330 = vmatpush3.bf16.xpose.msra.mxu0 %v1015_v28 }
 0x305   :  { %1331 = vmatprep.subr.bf16.mxu0 %v1576_v52 }
 0x30c   :  { %1332 = vmatpush3.bf16.xpose.msra.mxu0 %v1014_v31 }
 0x30d   :  { %1333 = vmatprep.subr.bf16.mxu0 %v1576_v52 }
 0x314   :  { %1334 = vmatpush3.bf16.xpose.msra.mxu0 %v1013_v36 }
 0x315   :  { %1335 = vmatprep.subr.bf16.mxu0 %v1576_v52 }
 0x31c   :  { %1336 = vmatpush3.bf16.xpose.msra.mxu0 %v1012_v60 }
 0x323   :  { %1338 = vmatmul.mubr.bf16.vlgmr.msra.gmra.mxu0 %v1011_v34 }
 0x3e3   :  { %v1056_v39 = vpop.f32.mrf.mxu0 }
 0x3e4   :  { %v1057_v32 = vadd.f32 %v1056_v39, %v1021_v38 }
 0x3e5   :  { %v1339_v33 = vpop.f32.mrf.mxu0 }
 0x3e6   :  { %1062 = vst [vmem:[#allocation3] sm:$0x1] %v1057_v32 }
 0x3e7   :  { %v1059_v52 = vpop.f32.mrf.mxu0 }
 0x3e8   :  { %1565 = shalt.err (!%p1562_p4)
}
 0x3e9   :  { %1072 = dma.vmem_to_hbm [thread:$0]  %s1070_s14, 16, %s1924_s11, [#allocation4]   ;;  %v1340_v35 = vpop.f32.mrf.mxu0 }
 0x3ea   :  { %1574 = dma.done.wait [#allocation4], 16  }
 0x3eb   :  { %1575 = vsyncadd [#allocation4], 4294967280 }
 0x3ec   :  { %1076 = vsyncpa [#allocation4], 1 }

</bundles_post_ra>
